<compile_context>
chip_gen: v6e
topology: v6e:2x2x1
jax: 0.10.0
libtpu: 0.0.40
codegen_flags: <defaults>
</compile_context>

<pallas_src>
import numpy as np
import jax
import jax.numpy as jnp
from jax.experimental import pallas as pl
from jax.experimental.pallas import tpu as pltpu


def _copy_kernel(x_ref, o_ref):
    # The slice semantics live entirely in the input BlockSpec's lane offset;
    # the kernel body is an aligned, full-tile copy.
    o_ref[...] = x_ref[...]


def _round_up(x, m):
    return (x + m - 1) // m * m


def _pick_tile(total, candidates):
    for c in candidates:
        if total % c == 0:
            return c
    return candidates[-1]


def rm_cp(x, K):
    """x: (..., T, C) array.  Returns x[..., K:, :] via a Pallas copy kernel
    whose index_map skips the first K*C flattened lanes (the cyclic prefix)."""
    orig_shape = x.shape
    assert x.ndim >= 2
    T, C = orig_shape[-2], orig_shape[-1]
    assert 0 <= K < T
    lead = orig_shape[:-2]
    B = 1
    for d in lead:
        B *= d

    Tout = T - K
    F_in = T * C           # flattened trailing width of the input
    off = K * C            # element offset of the first kept sample
    W = Tout * C           # flattened output width

    # --- layout / tiling: lane-dense, (8,128)-aligned tiles ---
    W_pad = _round_up(W, 128)
    TW = _pick_tile(W_pad, (1024, 512, 256, 128))
    B_pad = _round_up(B, 8)
    TB = _pick_tile(B_pad, (512, 256, 128, 64, 32, 16, 8))

    pad_left = (-off) % TW              # make the CP offset a lane-tile multiple
    aligned_off = off + pad_left
    off_blocks = aligned_off // TW      # static block offset used by index_map
    pad_right = W_pad - W               # lane-dense right padding
    assert pad_left + F_in + pad_right == aligned_off + W_pad

    xf = x.reshape(B, F_in)
    xp = jnp.pad(xf, ((0, B_pad - B), (pad_left, pad_right)))

    grid = (B_pad // TB, W_pad // TW)
    out = pl.pallas_call(
        _copy_kernel,
        out_shape=jax.ShapeDtypeStruct((B_pad, W_pad), x.dtype),
        grid_spec=pltpu.PrefetchScalarGridSpec(
            num_scalar_prefetch=0,
            grid=grid,
            in_specs=[
                # lane offset by `off_blocks` tiles implements x[..., K:, :]
                pl.BlockSpec((TB, TW), lambda i, j: (i, j + off_blocks)),
            ],
            out_specs=pl.BlockSpec((TB, TW), lambda i, j: (i, j)),
        ),
        compiler_params=pltpu.CompilerParams(
            dimension_semantics=("parallel", "parallel")),
    )(xp)

    out = out[:B, :W]
    return out.reshape(*lead, Tout, C)


class RMCPOpts:
    # small, self-consistent synthetic config (matches the channel model)
    S = 1
    M = 16
    N_pilot = 2
    K = 2
    L = 4
    decay = 4.0


if __name__ == "__main__":
    opt = RMCPOpts()
    N, P = 2, 2

    key = jax.random.PRNGKey(0)
    # Received OFDM symbols before CP removal: (N, P, S+1, M+K, 2)
    x = jax.random.normal(
        key, (N, P, opt.S + 1, opt.M + opt.K, 2), dtype=jnp.float32)

    y = rm_cp(x, opt.K)
    y = jax.block_until_ready(y)

    assert y.shape == (N, P, opt.S + 1, opt.M, 2)
    ref = np.asarray(x)[..., opt.K:, :]
    np.testing.assert_array_equal(np.asarray(y), ref)

    # extra case: leading-dim product not a multiple of 8 (exercises sublane pad)
    x2 = jax.random.normal(jax.random.PRNGKey(1),
                           (3, opt.M + opt.K, 2), dtype=jnp.float32)
    y2 = jax.block_until_ready(rm_cp(x2, opt.K))
    assert y2.shape == (3, opt.M, 2)
    np.testing.assert_array_equal(np.asarray(y2), np.asarray(x2)[..., opt.K:, :])

    print("KERNEL_OK")
</pallas_src>

<mosaic_0001>
module attributes {stable_mosaic.version = 11 : i64} {
  func.func @_copy_kernel(%arg0: i32, %arg1: i32, %arg2: memref<8x128xf32, #tpu.memory_space<vmem>>, %arg3: memref<8x128xf32, #tpu.memory_space<vmem>>) attributes {dimension_semantics = [#tpu.dimension_semantics<parallel>, #tpu.dimension_semantics<parallel>], iteration_bounds = array<i64: 1, 1>, scalar_prefetch = 0 : i64, scratch_operands = 0 : i64, tpu.core_type = #tpu.core_type<tc>, window_params = [{transform_indices = @transform_0, window_bounds = array<i64: 8, 128>}, {transform_indices = @transform_1, window_bounds = array<i64: 8, 128>}]} {
    %c0 = arith.constant 0 : index
    %c0_0 = arith.constant 0 : index
    %0 = vector.load %arg2[%c0, %c0_0] : memref<8x128xf32, #tpu.memory_space<vmem>>, vector<8x128xf32>
    %c0_1 = arith.constant 0 : index
    %c0_2 = arith.constant 0 : index
    %1 = vector.load %arg3[%c0_1, %c0_2] : memref<8x128xf32, #tpu.memory_space<vmem>>, vector<8x128xf32>
    tpu.vector_store %arg3[%c0_1, %c0_2], %0 {strides = array<i32>} : memref<8x128xf32, #tpu.memory_space<vmem>>, vector<8x128xf32>,
    return
  }
  func.func @transform_0(%arg0: i32, %arg1: i32) -> (i32, i32) {
    %c1_i32 = arith.constant 1 : i32
    %0 = arith.addi %arg1, %c1_i32 : i32
    %c0_i32 = arith.constant 0 : i32
    return %arg0, %0 : i32, i32
  }
  func.func @transform_1(%arg0: i32, %arg1: i32) -> (i32, i32) {
    %c0_i32 = arith.constant 0 : i32
    return %arg0, %arg1 : i32, i32
  }
}

</mosaic_0001>

<bundles_post_ra>
// kernel: tpu_custom_call.1
= control target key start
LH: loop header
LB: loop body
LE: loop exit
PB: predicated region body
PF: predicated region fallthrough
CT: control target
= control target key end

     0   :  { %6 = vsyncpa [#allocation3], 0  ;;  %s110_s0 = inlined_call_operand.hbm [shape: f32[8,256], index: 0, kind: input, shape index: {}]   ;;  %s111_s1 = inlined_call_operand.hbm [shape: f32[8,128], index: 1, kind: output, shape index: {}]  }
   0x1   :  { %7 = vsyncpa [#allocation4], 0  ;;  %s42_s8 = scalar_lea.hbm %s110_s0, 128  ;;  %s92_s9 = smov [#allocation2]  }
   0x2   :  { %s17_s10 = sshll.u32 %s92_s9, 4  ;;  %s18_s10 = int_to_ptr.vmem [resolvable:$true] %s17_s10 }
   0x3   :  { %s55_s11 = scalar_lea.vmem %s18_s10, 128  ;;  %p60_p1 = scmp.lt.s32.totalorder %s18_s10, %s18_s10 }
   0x4   :  { %p56_p0 = scmp.ne.s32.totalorder %s18_s10, %s55_s11  ;;  %p61_p2 = scmp.lt.s32.totalorder %s55_s11, %s55_s11 }
   0x6   :  { %p62_p3 = por %p61_p2, %p60_p1 }
   0x8   :  { %p63_p4 = pnand %p62_p3, %p56_p0 }
   0xa   :  { %66 = shalt.err (!%p63_p4)
}
   0xb   :  { %20 = dma.hbm_to_vmem [thread:$0]  %s42_s8, 128, %s18_s10, [#allocation3]  }
   0xc   :  { %88 = dma.done.wait [#allocation3], 128  }
   0xd   :  { %89 = vsyncadd [#allocation3], 4294967168  ;;  %s93_s12 = smov [#allocation5]   ;;  %v25_v0 = vld [vmem:[#allocation2] sm:$0xff] }
   0xe   :  { %s33_s13 = sshll.u32 %s93_s12, 4  ;;  %26 = vst [vmem:[#allocation5] sm:$0xff] %v25_v0  ;;  %s34_s13 = int_to_ptr.vmem [resolvable:$true] %s33_s13 }
   0xf   :  { %s68_s14 = scalar_lea.vmem %s34_s13, 128  ;;  %p73_p6 = scmp.lt.s32.totalorder %s34_s13, %s34_s13 }
  0x10   :  { %p69_p5 = scmp.ne.s32.totalorder %s34_s13, %s68_s14  ;;  %p74_p7 = scmp.lt.s32.totalorder %s68_s14, %s68_s14 }
  0x12   :  { %p75_p8 = por %p74_p7, %p73_p6 }
  0x14   :  { %p76_p9 = pnand %p75_p8, %p69_p5 }
  0x16   :  { %79 = shalt.err (!%p76_p9)
}
  0x17   :  { %36 = dma.vmem_to_hbm [thread:$0]  %s34_s13, 128, %s111_s1, [#allocation4]  }
  0x18   :  { %90 = dma.done.wait [#allocation4], 128  }
  0x19   :  { %91 = vsyncadd [#allocation4], 4294967168 }
  0x1a   :  { %40 = vsyncpa [#allocation3], 1 }
  0x1b   :  { %41 = vsyncpa [#allocation4], 1 }

</bundles_post_ra>
